<compile_context>
chip_gen: v7x
topology: tpu7x:2x2x1
jax: 0.10.0
libtpu: 0.0.40
codegen_flags: <defaults>
</compile_context>

<pallas_src>
import functools

import jax
import jax.numpy as jnp
from jax.experimental import pallas as pl
from jax.experimental.pallas import tpu as pltpu


def _round_up(x, m):
    return ((x + m - 1) // m) * m


def _vmem_limit_bytes():
    """Scoped-VMEM limit: ~7/8 of physical per-core VMEM, capped at 112 MiB.

    Defaults (16 MiB v5e / 32 MiB v6e,v7x) are exhausted by the adjacency
    tile double-buffer at moderate N; physical is 128 MiB (v5e/v6e) and
    64 MiB per TensorCore (v7x).
    """
    cap = 64 << 20                      # conservative fallback (v7x per-TC)
    try:
        info = pltpu.get_tpu_info()
        cap = int(getattr(info, "vmem_capacity_bytes", cap) or cap)
    except Exception:
        pass
    return min((cap * 7) // 8, 112 << 20)


def _pick_tile(n_pad, g_pad, lane, budget):
    """Largest node-row tile TN (divisor of n_pad) whose working set fits."""
    for tn in (512, 256, 128):
        if n_pad % tn:
            continue
        need = (2 * tn * n_pad * 1         # (A+I) int8 row tile, double-buffered
                + tn * n_pad * 2           # in-kernel bf16 copy of the tile
                + 2 * g_pad * tn * 2       # P column tile (bf16), double-buffered
                + 2 * tn * 128 * 4         # d_row tile (f32, lane-padded), x2
                + 2 * n_pad * lane * 2     # XW1 (conservatively assume 2 bufs)
                + 2 * lane * 4             # b1
                + 2 * lane * lane * 2      # W2
                + 2 * g_pad * lane * 4     # output block
                + g_pad * lane * 4         # pooled accumulator scratch
                + 3 * tn * lane * 4)       # ax / h temporaries
        if need <= budget:
            return tn
    return 128


def _const_spec(block_shape, index_map):
    """BlockSpec for constant-index resident inputs; single-buffered when the
    installed jax supports pipeline_mode (halves their VMEM footprint)."""
    try:
        return pl.BlockSpec(block_shape, index_map, pipeline_mode=pl.Buffered(1))
    except TypeError:
        return pl.BlockSpec(block_shape, index_map)


# ----------------------------------------------------------------------------
# Pallas kernel.
# Grid: (split, node-row tiles)   split = "parallel" (v7x 2-TC), tiles = "arbitrary".
#   a_ref    : (TN, N_pad)   int8  row tile of UNNORMALIZED (A + I)
#   xw1_ref  : (N_pad, LANE) bf16  (d_col^-1/2 · X W1), resident
#   drow_ref : (TN, 1)       f32   row degree scale d_row^-1/2 for this tile
#   b1_ref   : (1, LANE)     f32
#   p_ref    : (G_pad, TN)   bf16  column tile of mean-pool matrix
#   w2_ref   : (LANE, LANE)  bf16
#   out_ref  : (G_pad, LANE) f32   per-split partial (pool @ W2) slab
#   pool_scr : (G_pad, LANE) f32   pooled-hidden accumulator
# ----------------------------------------------------------------------------
def gcn_kernel(a_ref, xw1_ref, drow_ref, b1_ref, p_ref, w2_ref, out_ref,
               pool_scr):
    i = pl.program_id(1)               # reduction axis (last, "arbitrary")

    @pl.when(i == 0)
    def _init():
        pool_scr[...] = jnp.zeros_like(pool_scr)

    # Message passing for this row tile:  (A+I)_tile @ (d_col · X W1).
    # int8 0/1/2 entries are exact; only the HBM stream is 1 B/elem.
    ax = jnp.dot(a_ref[...].astype(jnp.bfloat16), xw1_ref[...],
                 preferred_element_type=jnp.float32)
    # Row degree scale + bias + ReLU (f32 VPU epilogue).
    h = jnp.maximum(ax * drow_ref[...] + b1_ref[...], 0.0)

    # Partial per-graph mean pool for this tile's nodes (f32 accumulation).
    # Padded / phantom rows have drow = 0 -> h = relu(b1), but P's zero
    # columns mask them, so they never reach the pooled result.
    pool_scr[...] += jnp.dot(p_ref[...], h.astype(jnp.bfloat16),
                             preferred_element_type=jnp.float32)

    @pl.when(i == pl.num_programs(1) - 1)
    def _finalize():
        # Head matmul only; b2 is added outside after the per-split partial
        # slabs are summed (the head is linear, so summing partials is exact).
        out_ref[...] = jnp.dot(pool_scr[...].astype(jnp.bfloat16), w2_ref[...],
                               preferred_element_type=jnp.float32)


# ----------------------------------------------------------------------------
# Jitted forward: adjacency/pool glue + padding + pallas_call, one XLA launch.
# num_graphs is static (no device->host sync).
# ----------------------------------------------------------------------------
@functools.partial(jax.jit, static_argnames=("num_graphs",))
def gcn_forward(x, edge_index, batch, w1, b1, w2, b2, *, num_graphs):
    n, _ = x.shape
    h_dim = w1.shape[1]
    c_dim = w2.shape[1]

    # Lane/sublane-dense padded dims.  N is padded to 128 granularity so the
    # O(N^2) adjacency stream is not inflated by the tile size.
    n_pad = _round_up(n, 128)
    lane = max(_round_up(h_dim, 128), _round_up(c_dim, 128))
    g_pad = _round_up(num_graphs, 8)

    vmem_limit = _vmem_limit_bytes()
    tn = _pick_tile(n_pad, g_pad, lane, (vmem_limit * 3) // 4)
    n_tiles = n_pad // tn
    # Leading "parallel" axis: splits the row range across the two
    # TensorCores on v7x; degenerates to 1 for a single tile / odd tile count.
    split = 2 if (n_tiles >= 2 and n_tiles % 2 == 0) else 1
    kt = n_tiles // split

    # Unnormalized (A + I) as int8; degree scales kept exact in f32.
    adj = jnp.zeros((n, n), jnp.int8)
    adj = adj.at[edge_index[0], edge_index[1]].set(1)
    adj = adj.at[edge_index[1], edge_index[0]].set(1)     # undirected
    adj = adj + jnp.eye(n, dtype=jnp.int8)                # self loops
    deg = jnp.sum(adj.astype(jnp.float32), axis=1)
    d_inv_sqrt = 1.0 / jnp.sqrt(jnp.maximum(deg, 1e-12))

    # Hoisted X @ W1 with the COLUMN degree scale folded in:
    #   Â X W1 = d_row · ( (A+I) @ (d_col · X W1) )
    xw1 = d_inv_sqrt[:, None] * jnp.dot(x.astype(jnp.float32), w1)

    # Per-graph mean-pool matrix (built from REAL nodes only, so zero-padded
    # phantom node columns never dilute the mean and mask relu(b1) rows).
    onehot = (batch[None, :] == jnp.arange(num_graphs)[:, None]).astype(
        jnp.float32)
    counts = jnp.maximum(jnp.sum(onehot, axis=1, keepdims=True), 1.0)
    p_pool = onehot / counts

    def pad2(a, rows, cols):
        return jnp.pad(a, ((0, rows - a.shape[0]), (0, cols - a.shape[1])))

    a_p = pad2(adj, n_pad, n_pad)                                  # int8
    xw1_p = pad2(xw1, n_pad, lane).astype(jnp.bfloat16)
    drow_p = jnp.pad(d_inv_sqrt, (0, n_pad - n)).reshape(n_pad, 1)  # f32
    b1_p = jnp.zeros((1, lane), jnp.float32).at[0, :h_dim].set(b1.reshape(-1))
    p_p = pad2(p_pool, g_pad, n_pad).astype(jnp.bfloat16)
    w2_p = pad2(w2, lane, lane).astype(jnp.bfloat16)

    out_parts = pl.pallas_call(
        gcn_kernel,
        out_shape=jax.ShapeDtypeStruct((split, g_pad, lane), jnp.float32),
        grid_spec=pltpu.PrefetchScalarGridSpec(
            num_scalar_prefetch=0,
            grid=(split, kt),
            in_specs=[
                pl.BlockSpec((tn, n_pad), lambda c, i: (c * kt + i, 0)),   # A+I
                _const_spec((n_pad, lane), lambda c, i: (0, 0)),           # XW1
                pl.BlockSpec((tn, 1), lambda c, i: (c * kt + i, 0)),       # d_row
                _const_spec((1, lane), lambda c, i: (0, 0)),               # b1
                pl.BlockSpec((g_pad, tn), lambda c, i: (0, c * kt + i)),   # P
                _const_spec((lane, lane), lambda c, i: (0, 0)),            # W2
            ],
            out_specs=pl.BlockSpec((None, g_pad, lane),
                                   lambda c, i: (c, 0, 0)),
            scratch_shapes=[
                pltpu.VMEM((g_pad, lane), jnp.float32),   # pooled accumulator
            ],
        ),
        compiler_params=pltpu.CompilerParams(
            dimension_semantics=("parallel", "arbitrary"),
            vmem_limit_bytes=vmem_limit),
    )(a_p, xw1_p, drow_p, b1_p, p_p, w2_p)

    # Sum the per-TensorCore partial head slabs (exact: head is linear),
    # add b2, slice away lane/sublane padding.
    return jnp.sum(out_parts, axis=0)[:num_graphs, :c_dim] + b2


# ----------------------------------------------------------------------------
# Inner "model": synthetic GCN with deterministic parameters.
# ----------------------------------------------------------------------------
class SyntheticGCN:
    def __init__(self, in_features, hidden, num_classes, num_graphs, key):
        k1, k2 = jax.random.split(key)
        scale1 = 1.0 / jnp.sqrt(jnp.float32(in_features))
        scale2 = 1.0 / jnp.sqrt(jnp.float32(hidden))
        self.w1 = (jax.random.normal(k1, (in_features, hidden), jnp.float32)
                   * scale1)
        self.b1 = jnp.zeros((1, hidden), jnp.float32)
        self.w2 = (jax.random.normal(k2, (hidden, num_classes), jnp.float32)
                   * scale2)
        self.b2 = jnp.zeros((1, num_classes), jnp.float32)
        self.num_graphs = int(num_graphs)   # static config (no device sync)

    def __call__(self, x, edge_index, batch=None):
        if batch is None:
            batch = jnp.zeros((x.shape[0],), jnp.int32)
            num_graphs = 1
        else:
            num_graphs = self.num_graphs
        return gcn_forward(x, edge_index, batch, self.w1, self.b1,
                           self.w2, self.b2, num_graphs=num_graphs)


# ----------------------------------------------------------------------------
# The UniversalDataModelWrapper — same dispatch semantics as the PyTorch code.
# ----------------------------------------------------------------------------
class UniversalDataModelWrapper:
    def __init__(self, model):
        self.model = model

    def __call__(self, *args, **kwargs):
        if (len(args) == 1 and hasattr(args[0], 'x')
                and hasattr(args[0], 'edge_index')):
            data = args[0]
            return self.model(x=data.x, edge_index=data.edge_index,
                              batch=getattr(data, 'batch', None))
        elif len(args) >= 2:
            return self.model(*args, **kwargs)
        elif 'data' in kwargs:
            data = kwargs['data']
            return self.model(x=data.x, edge_index=data.edge_index,
                              batch=getattr(data, 'batch', None))
        else:
            raise TypeError('Unsupported input signature for model wrapper.')


class Data:
    """Minimal PyG-like data holder."""
    def __init__(self, x, edge_index, batch=None):
        self.x = x
        self.edge_index = edge_index
        self.batch = batch


# ----------------------------------------------------------------------------
# Pure-JAX f32 reference (no Pallas) for correctness check.
# ----------------------------------------------------------------------------
def reference_forward(model, x, edge_index, batch, num_graphs):
    n = x.shape[0]
    adj = jnp.zeros((n, n), jnp.float32)
    src, dst = edge_index[0], edge_index[1]
    adj = adj.at[src, dst].set(1.0)
    adj = adj.at[dst, src].set(1.0)
    adj = adj + jnp.eye(n, dtype=jnp.float32)
    deg = jnp.sum(adj, axis=1)
    d = 1.0 / jnp.sqrt(jnp.maximum(deg, 1e-12))
    a_norm = adj * d[:, None] * d[None, :]
    h = jnp.maximum(a_norm @ x @ model.w1 + model.b1, 0.0)
    onehot = (batch[None, :] == jnp.arange(num_graphs)[:, None]).astype(
        jnp.float32)
    p = onehot / jnp.maximum(jnp.sum(onehot, axis=1, keepdims=True), 1.0)
    return p @ h @ model.w2 + model.b2


if __name__ == "__main__":
    key = jax.random.PRNGKey(0)
    k_param, k_x, k_e = jax.random.split(key, 3)

    # Small graph: 16 nodes, 32 features, 24 edges, 2 graphs in the batch.
    N, F, H, C, G, E = 16, 32, 32, 8, 2, 24
    x = jax.random.normal(k_x, (N, F), jnp.float32)
    # Keep edges within each graph's node range (graph 0: 0-7, graph 1: 8-15).
    src0 = jax.random.randint(k_e, (E // 2,), 0, 8)
    dst0 = jax.random.randint(jax.random.fold_in(k_e, 1), (E // 2,), 0, 8)
    src1 = jax.random.randint(jax.random.fold_in(k_e, 2), (E // 2,), 8, 16)
    dst1 = jax.random.randint(jax.random.fold_in(k_e, 3), (E // 2,), 8, 16)
    edge_index = jnp.stack([jnp.concatenate([src0, src1]),
                            jnp.concatenate([dst0, dst1])]).astype(jnp.int32)
    batch = jnp.concatenate([jnp.zeros((8,), jnp.int32),
                             jnp.ones((8,), jnp.int32)])

    inner_model = SyntheticGCN(F, H, C, G, k_param)
    model = UniversalDataModelWrapper(inner_model)

    # Path 1: single Data-like positional argument.
    data = Data(x=x, edge_index=edge_index, batch=batch)
    out = jax.block_until_ready(model(data))

    # Path 2: explicit positional args (>= 2 args branch).
    out2 = jax.block_until_ready(model(x, edge_index, batch))

    # Path 3: kwargs 'data' branch.
    out3 = jax.block_until_ready(model(data=data))

    ref = reference_forward(inner_model, x, edge_index, batch, G)
    assert out.shape == (G, C)
    # Adjacency is now exact (int8 0/1 + f32 degree scales); bf16 is only used
    # for XW1 / P / W2 MXU operands. Tolerance kept loose for robustness.
    assert jnp.allclose(out, ref, atol=6e-2, rtol=6e-2)
    assert jnp.allclose(out2, ref, atol=6e-2, rtol=6e-2)
    assert jnp.allclose(out3, ref, atol=6e-2, rtol=6e-2)

    print("KERNEL_OK")
</pallas_src>

<mosaic_0001>
module attributes {stable_mosaic.version = 11 : i64} {
  func.func @gcn_kernel(%arg0: i32, %arg1: i32, %arg2: memref<128x128xi8, #tpu.memory_space<vmem>>, %arg3: memref<128x128xbf16, #tpu.memory_space<vmem>>, %arg4: memref<128x1xf32, #tpu.memory_space<vmem>>, %arg5: memref<1x128xf32, #tpu.memory_space<vmem>>, %arg6: memref<8x128xbf16, #tpu.memory_space<vmem>>, %arg7: memref<128x128xbf16, #tpu.memory_space<vmem>>, %arg8: memref<1x8x128xf32, #tpu.memory_space<vmem>>, %arg9: memref<8x128xf32, #tpu.memory_space<vmem>>) attributes {dimension_semantics = [#tpu.dimension_semantics<parallel>, #tpu.dimension_semantics<arbitrary>], iteration_bounds = array<i64: 1, 1>, scalar_prefetch = 0 : i64, scratch_operands = 1 : i64, tpu.core_type = #tpu.core_type<tc>, window_params = [{transform_indices = @transform_0, window_bounds = array<i64: 128, 128>}, {pipeline_mode = #tpu.pipeline_mode<synchronous>, transform_indices = @transform_1, window_bounds = array<i64: 128, 128>}, {transform_indices = @transform_2, window_bounds = array<i64: 128, 1>}, {pipeline_mode = #tpu.pipeline_mode<synchronous>, transform_indices = @transform_3, window_bounds = array<i64: 1, 128>}, {transform_indices = @transform_4, window_bounds = array<i64: 8, 128>}, {pipeline_mode = #tpu.pipeline_mode<synchronous>, transform_indices = @transform_5, window_bounds = array<i64: 128, 128>}, {transform_indices = @transform_6, window_bounds = array<i64: 1, 8, 128>}]} {
    %c0_i32 = arith.constant 0 : i32
    %0 = arith.cmpi eq, %arg1, %c0_i32 : i32
    %1 = arith.extui %0 : i1 to i32
    %c0_i32_0 = arith.constant 0 : i32
    %2 = arith.cmpi ne, %1, %c0_i32_0 : i32
    scf.if %2 {
      %cst_18 = arith.constant 0.000000e+00 : f32
      %24 = vector.broadcast %cst_18 : f32 to vector<8x128xf32>
      %c0_19 = arith.constant 0 : index
      %c0_20 = arith.constant 0 : index
      %25 = vector.load %arg9[%c0_19, %c0_20] : memref<8x128xf32, #tpu.memory_space<vmem>>, vector<8x128xf32>
      tpu.vector_store %arg9[%c0_19, %c0_20], %24 {strides = array<i32>} : memref<8x128xf32, #tpu.memory_space<vmem>>, vector<8x128xf32>,
    } else {
    }
    %c0 = arith.constant 0 : index
    %c0_1 = arith.constant 0 : index
    %3 = vector.load %arg2[%c0, %c0_1] : memref<128x128xi8, #tpu.memory_space<vmem>>, vector<128x128xi8>
    %4 = arith.sitofp %3 : vector<128x128xi8> to vector<128x128xbf16>
    %c0_2 = arith.constant 0 : index
    %c0_3 = arith.constant 0 : index
    %5 = vector.load %arg3[%c0_2, %c0_3] : memref<128x128xbf16, #tpu.memory_space<vmem>>, vector<128x128xbf16>
    %cst = arith.constant dense<0.000000e+00> : vector<128x128xf32>
    %6 = tpu.matmul %4, %5, %cst {dimension_numbers = #tpu.dot_dimension_numbers<[1], [0], [0], [1], [0, 0, 1, 1], [], []>} : vector<128x128xbf16>, vector<128x128xbf16>, vector<128x128xf32> -> vector<128x128xf32>
    %c0_4 = arith.constant 0 : index
    %c0_5 = arith.constant 0 : index
    %7 = vector.load %arg4[%c0_4, %c0_5] : memref<128x1xf32, #tpu.memory_space<vmem>>, vector<128x1xf32>
    %8 = vector.broadcast %7 : vector<128x1xf32> to vector<128x128xf32>
    %9 = arith.mulf %6, %8 : vector<128x128xf32>
    %c0_6 = arith.constant 0 : index
    %c0_7 = arith.constant 0 : index
    %10 = vector.load %arg5[%c0_6, %c0_7] : memref<1x128xf32, #tpu.memory_space<vmem>>, vector<1x128xf32>
    %11 = vector.broadcast %10 : vector<1x128xf32> to vector<128x128xf32>
    %12 = arith.addf %9, %11 : vector<128x128xf32>
    %cst_8 = arith.constant 0.000000e+00 : f32
    %13 = vector.broadcast %cst_8 : f32 to vector<128x128xf32>
    %14 = arith.maximumf %12, %13 : vector<128x128xf32>
    %c0_9 = arith.constant 0 : index
    %c0_10 = arith.constant 0 : index
    %15 = vector.load %arg9[%c0_9, %c0_10] : memref<8x128xf32, #tpu.memory_space<vmem>>, vector<8x128xf32>
    %c0_11 = arith.constant 0 : index
    %c0_12 = arith.constant 0 : index
    %16 = vector.load %arg6[%c0_11, %c0_12] : memref<8x128xbf16, #tpu.memory_space<vmem>>, vector<8x128xbf16>
    %17 = arith.truncf %14 : vector<128x128xf32> to vector<128x128xbf16>
    %cst_13 = arith.constant dense<0.000000e+00> : vector<8x128xf32>
    %18 = tpu.matmul %16, %17, %cst_13 {dimension_numbers = #tpu.dot_dimension_numbers<[1], [0], [0], [1], [0, 0, 1, 1], [], []>} : vector<8x128xbf16>, vector<128x128xbf16>, vector<8x128xf32> -> vector<8x128xf32>
    %19 = arith.addf %15, %18 : vector<8x128xf32>
    %c0_14 = arith.constant 0 : index
    %c0_15 = arith.constant 0 : index
    %20 = vector.load %arg9[%c0_14, %c0_15] : memref<8x128xf32, #tpu.memory_space<vmem>>, vector<8x128xf32>
    tpu.vector_store %arg9[%c0_14, %c0_15], %19 {strides = array<i32>} : memref<8x128xf32, #tpu.memory_space<vmem>>, vector<8x128xf32>,
    %c0_i32_16 = arith.constant 0 : i32
    %21 = arith.cmpi eq, %arg1, %c0_i32_16 : i32
    %22 = arith.extui %21 : i1 to i32
    %c0_i32_17 = arith.constant 0 : i32
    %23 = arith.cmpi ne, %22, %c0_i32_17 : i32
    scf.if %23 {
      %c0_18 = arith.constant 0 : index
      %c0_19 = arith.constant 0 : index
      %24 = vector.load %arg9[%c0_18, %c0_19] : memref<8x128xf32, #tpu.memory_space<vmem>>, vector<8x128xf32>
      %25 = arith.truncf %24 : vector<8x128xf32> to vector<8x128xbf16>
      %c0_20 = arith.constant 0 : index
      %c0_21 = arith.constant 0 : index
      %26 = vector.load %arg7[%c0_20, %c0_21] : memref<128x128xbf16, #tpu.memory_space<vmem>>, vector<128x128xbf16>
      %cst_22 = arith.constant dense<0.000000e+00> : vector<8x128xf32>
      %27 = tpu.matmul %25, %26, %cst_22 {dimension_numbers = #tpu.dot_dimension_numbers<[1], [0], [0], [1], [0, 0, 1, 1], [], []>} : vector<8x128xbf16>, vector<128x128xbf16>, vector<8x128xf32> -> vector<8x128xf32>
      %c0_23 = arith.constant 0 : index
      %c0_24 = arith.constant 0 : index
      %c0_25 = arith.constant 0 : index
      %28 = vector.load %arg8[%c0_23, %c0_24, %c0_25] : memref<1x8x128xf32, #tpu.memory_space<vmem>>, vector<1x8x128xf32>
      %29 = vector.shape_cast %28 : vector<1x8x128xf32> to vector<8x128xf32>
      %30 = vector.shape_cast %27 : vector<8x128xf32> to vector<1x8x128xf32>
      tpu.vector_store %arg8[%c0_23, %c0_24, %c0_25], %30 {strides = array<i32>} : memref<1x8x128xf32, #tpu.memory_space<vmem>>, vector<1x8x128xf32>,
    } else {
    }
    return
  }
  func.func @transform_0(%arg0: i32, %arg1: i32) -> (i32, i32) {
    %c1_i32 = arith.constant 1 : i32
    %0 = arith.muli %arg0, %c1_i32 : i32
    %1 = arith.addi %0, %arg1 : i32
    %c0_i32 = arith.constant 0 : i32
    %c0_i32_0 = arith.constant 0 : i32
    return %1, %c0_i32 : i32, i32
  }
  func.func @transform_1(%arg0: i32, %arg1: i32) -> (i32, i32) {
    %c0_i32 = arith.constant 0 : i32
    %c0_i32_0 = arith.constant 0 : i32
    %c0_i32_1 = arith.constant 0 : i32
    return %c0_i32, %c0_i32_0 : i32, i32
  }
  func.func @transform_2(%arg0: i32, %arg1: i32) -> (i32, i32) {
    %c1_i32 = arith.constant 1 : i32
    %0 = arith.muli %arg0, %c1_i32 : i32
    %1 = arith.addi %0, %arg1 : i32
    %c0_i32 = arith.constant 0 : i32
    %c0_i32_0 = arith.constant 0 : i32
    return %1, %c0_i32 : i32, i32
  }
  func.func @transform_3(%arg0: i32, %arg1: i32) -> (i32, i32) {
    %c0_i32 = arith.constant 0 : i32
    %c0_i32_0 = arith.constant 0 : i32
    %c0_i32_1 = arith.constant 0 : i32
    return %c0_i32, %c0_i32_0 : i32, i32
  }
  func.func @transform_4(%arg0: i32, %arg1: i32) -> (i32, i32) {
    %c1_i32 = arith.constant 1 : i32
    %0 = arith.muli %arg0, %c1_i32 : i32
    %1 = arith.addi %0, %arg1 : i32
    %c0_i32 = arith.constant 0 : i32
    %c0_i32_0 = arith.constant 0 : i32
    return %c0_i32, %1 : i32, i32
  }
  func.func @transform_5(%arg0: i32, %arg1: i32) -> (i32, i32) {
    %c0_i32 = arith.constant 0 : i32
    %c0_i32_0 = arith.constant 0 : i32
    %c0_i32_1 = arith.constant 0 : i32
    return %c0_i32, %c0_i32_0 : i32, i32
  }
  func.func @transform_6(%arg0: i32, %arg1: i32) -> (i32, i32, i32) {
    %c0_i32 = arith.constant 0 : i32
    %c0_i32_0 = arith.constant 0 : i32
    %c0_i32_1 = arith.constant 0 : i32
    return %arg0, %c0_i32, %c0_i32_0 : i32, i32, i32
  }
}

</mosaic_0001>

<bundles_post_ra>
// kernel: gcn_forward.1
= control target key start
LH: loop header
LB: loop body
LE: loop exit
PB: predicated region body
PF: predicated region fallthrough
CT: control target
= control target key end

     0   :  { %v742_v1 = vmov 0   ;;  %v743_v37 = vmov 0.0   ;;  %vm744_vm0 = vmmov 0   ;;  %s933_s1 = inlined_call_operand.vmem [shape: bf16[128,128], index: 1, kind: input, shape index: {}]   ;;  %s934_s0 = inlined_call_operand.vmem [shape: s8[128,128], index: 0, kind: input, shape index: {}]   ;;  %s935_s2 = inlined_call_operand.vmem [shape: f32[128,1], index: 2, kind: input, shape index: {}]   ;;  %s936_s5 = inlined_call_operand.vmem [shape: bf16[128,128], index: 5, kind: input, shape index: {}]   ;;  %s937_s3 = inlined_call_operand.vmem [shape: f32[1,128], index: 3, kind: input, shape index: {}]   ;;  %s938_s4 = inlined_call_operand.vmem [shape: bf16[8,128], index: 4, kind: input, shape index: {}]   ;;  %s939_s6 = inlined_call_operand.vmem [shape: f32[1,8,128], index: 6, kind: output, shape index: {}]  }
   0x1   :  { %v726_v0 = vld [vmem:[%s933_s1] sm:$0xff]   ;;  %724 = vset.pattern.permute.xlu0 %v742_v1  ;;  %725 = vset.pattern.permute.xlu1 %v742_v1  ;;  %v727_v2 = vld [vmem:[%s933_s1 + $0x8] sm:$0xff]   ;;  %v728_v3 = vld [vmem:[%s933_s1 + $0x10] sm:$0xff]  }
   0x2   :  { %649 = vmatprep.subr.bf16.mxu0 %v726_v0  ;;  %v729_v4 = vld [vmem:[%s933_s1 + $0x18] sm:$0xff]   ;;  %v90_v5 = vld [vmem:[%s934_s0] sm:$0xff]  ;;  %v265_v8 = vld [vmem:[%s935_s2 + $0x10] sm:$0xff]  ;;  %681 = vmatprep.subr.bf16.mxu1 %v743_v37 }
   0x3   :  { %650 = vmatpush3.bf16.msra.mxu0 %v726_v0  ;;  %v94_v6 = vunpack.c.l.s8.bf16 %v90_v5  ;;  %v263_v7 = vld [vmem:[%s935_s2] sm:$0xff]  ;;  %291 = vperm.xlu1 %725, %v265_v8   ;;  %v264_v9 = vld [vmem:[%s935_s2 + $0x8] sm:$0xff]  ;;  %v266_v10 = vld [vmem:[%s935_s2 + $0x18] sm:$0xff]  ;;  %v95_v24 = vunpack.c.h.s8.bf16 %v90_v5 }
   0x4   :  { %651 = vmatprep.subr.bf16.mxu0 %v727_v2  ;;  %281 = vperm.xlu0 %724, %v263_v7   ;;  %v730_v11 = vld [vmem:[%s933_s1 + $0x20] sm:$0xff]   ;;  %v268_v13 = vld [vmem:[%s935_s2 + $0x28] sm:$0xff]  ;;  %v269_v15 = vld [vmem:[%s935_s2 + $0x30] sm:$0xff] }
   0x5   :  { %665 = vmatprep.mubr.bf16.mxu0 %v94_v6  ;;  %v267_v12 = vld [vmem:[%s935_s2 + $0x20] sm:$0xff]  ;;  %v731_v14 = vld [vmem:[%s933_s1 + $0x28] sm:$0xff]   ;;  %v270_v16 = vld [vmem:[%s935_s2 + $0x38] sm:$0xff]  ;;  %697 = vmatprep.mubr.msk.bf16.mxu1 %vm744_vm0, %v743_v37 }
   0x6   :  { %v732_v17 = vld [vmem:[%s933_s1 + $0x30] sm:$0xff]   ;;  %v271_v18 = vld [vmem:[%s935_s2 + $0x40] sm:$0xff]  ;;  %v272_v19 = vld [vmem:[%s935_s2 + $0x48] sm:$0xff] }
   0x7   :  { %652 = vmatpush3.bf16.msra.mxu0 %v727_v2  ;;  %296 = vperm.xlu1 %725, %v266_v10   ;;  %v733_v20 = vld [vmem:[%s933_s1 + $0x38] sm:$0xff]   ;;  %v273_v21 = vld [vmem:[%s935_s2 + $0x50] sm:$0xff]  ;;  %v91_v23 = vld [vmem:[%s934_s0 + $0x8] sm:$0xff] }
   0x8   :  { %653 = vmatprep.subr.bf16.mxu0 %v728_v3  ;;  %286 = vperm.xlu0 %724, %v264_v9   ;;  %v274_v22 = vld [vmem:[%s935_s2 + $0x58] sm:$0xff]  ;;  %v96_v25 = vunpack.c.l.s8.bf16 %v91_v23  ;;  %v275_v26 = vld [vmem:[%s935_s2 + $0x60] sm:$0xff]  ;;  %v276_v27 = vld [vmem:[%s935_s2 + $0x68] sm:$0xff]  ;;  %v97_v31 = vunpack.c.h.s8.bf16 %v91_v23 }
   0x9   :  { %v277_v28 = vld [vmem:[%s935_s2 + $0x70] sm:$0xff]  ;;  %v278_v30 = vld [vmem:[%s935_s2 + $0x78] sm:$0xff]  ;;  %v734_v38 = vld [vmem:[%s936_s5] sm:$0xff]  }
   0xa   :  { %v92_v29 = vld [vmem:[%s934_s0 + $0x10] sm:$0xff]  ;;  %v93_v33 = vld [vmem:[%s934_s0 + $0x18] sm:$0xff]  ;;  %v735_v39 = vld [vmem:[%s936_s5 + $0x8] sm:$0xff]  }
   0xb   :  { %654 = vmatpush3.bf16.msra.mxu0 %v728_v3  ;;  %306 = vperm.xlu1 %725, %v268_v13   ;;  %v98_v32 = vunpack.c.l.s8.bf16 %v92_v29  ;;  %v99_v34 = vunpack.c.h.s8.bf16 %v92_v29  ;;  %v100_v35 = vunpack.c.l.s8.bf16 %v93_v33  ;;  %v101_v36 = vunpack.c.h.s8.bf16 %v93_v33  ;;  %v736_v40 = vld [vmem:[%s936_s5 + $0x10] sm:$0xff]   ;;  %v737_v41 = vld [vmem:[%s936_s5 + $0x18] sm:$0xff]   ;;  %v738_v42 = vld [vmem:[%s936_s5 + $0x20] sm:$0xff]  }
   0xc   :  { %655 = vmatprep.subr.bf16.mxu0 %v729_v4  ;;  %301 = vperm.xlu0 %724, %v267_v12   ;;  %v739_v43 = vld [vmem:[%s936_s5 + $0x28] sm:$0xff]   ;;  %v740_v44 = vld [vmem:[%s936_s5 + $0x30] sm:$0xff]   ;;  %v741_v45 = vld [vmem:[%s936_s5 + $0x38] sm:$0xff]  }
   0xd   :  { %v902_v54 = vld [vmem:[%s937_s3] ss:$0 sm:$0xff] }
   0xf   :  { %656 = vmatpush3.bf16.msra.mxu0 %v729_v4  ;;  %316 = vperm.xlu1 %725, %v270_v16  }
  0x10   :  { %657 = vmatprep.subr.bf16.mxu0 %v730_v11  ;;  %311 = vperm.xlu0 %724, %v269_v15  }
  0x13   :  { %658 = vmatpush3.bf16.msra.mxu0 %v730_v11  ;;  %326 = vperm.xlu1 %725, %v272_v19  }
  0x14   :  { %659 = vmatprep.subr.bf16.mxu0 %v731_v14  ;;  %321 = vperm.xlu0 %724, %v271_v18  }
  0x17   :  { %660 = vmatpush3.bf16.msra.mxu0 %v731_v14  ;;  %336 = vperm.xlu1 %725, %v274_v22  }
  0x18   :  { %661 = vmatprep.subr.bf16.mxu0 %v732_v17  ;;  %331 = vperm.xlu0 %724, %v273_v21  }
  0x1b   :  { %662 = vmatpush3.bf16.msra.mxu0 %v732_v17  ;;  %346 = vperm.xlu1 %725, %v276_v27  }
  0x1c   :  { %663 = vmatprep.subr.bf16.mxu0 %v733_v20  ;;  %341 = vperm.xlu0 %724, %v275_v26  }
  0x1f   :  { %664 = vmatpush3.bf16.msra.mxu0 %v733_v20  ;;  %356 = vperm.xlu1 %725, %v278_v30  }
  0x20   :  { %351 = vperm.xlu0 %724, %v277_v28   ;;  %701 = vmatprep.subr.bf16.mxu0 %v743_v37 }
  0x22   :  { %666 = vmatmul.mubr.bf16.vlgmr.msra.gmra.mrb[0].mxu0 %v95_v24 }
  0x23   :  { %669 = vmatprep.mubr.bf16.mxu0 %v96_v25  ;;  %702 = vmatpush3.bf16.msra.mxu0 %v734_v38 }
  0x24   :  { %703 = vmatprep.subr.bf16.mxu0 %v743_v37 }
  0x27   :  { %704 = vmatpush3.bf16.msra.mxu0 %v735_v39 }
  0x28   :  { %705 = vmatprep.subr.bf16.mxu0 %v743_v37 }
  0x2a   :  { %670 = vmatmul.mubr.bf16.gmra.mrb[4].mxu0 %v97_v31 }
  0x2b   :  { %673 = vmatprep.mubr.bf16.mxu0 %v98_v32  ;;  %706 = vmatpush3.bf16.msra.mxu0 %v736_v40 }
  0x2c   :  { %707 = vmatprep.subr.bf16.mxu0 %v743_v37 }
  0x2f   :  { %708 = vmatpush3.bf16.msra.mxu0 %v737_v41 }
  0x30   :  { %709 = vmatprep.subr.bf16.mxu0 %v743_v37 }
  0x32   :  { %674 = vmatmul.mubr.bf16.gmra.mrb[8].mxu0 %v99_v34 }
  0x33   :  { %677 = vmatprep.mubr.bf16.mxu0 %v100_v35  ;;  %710 = vmatpush3.bf16.msra.mxu0 %v738_v42 }
  0x34   :  { %711 = vmatprep.subr.bf16.mxu0 %v743_v37 }
  0x37   :  { %712 = vmatpush3.bf16.msra.mxu0 %v739_v43 }
  0x38   :  { %713 = vmatprep.subr.bf16.mxu0 %v743_v37 }
  0x3a   :  { %678 = vmatmul.mubr.bf16.gmra.mrb[12].mxu0 %v101_v36 }
  0x3b   :  { %717 = vmatprep.mubr.msk.bf16.mxu0 %vm744_vm0, %v743_v37  ;;  %714 = vmatpush3.bf16.msra.mxu0 %v740_v44 }
  0x3c   :  { %715 = vmatprep.subr.bf16.mxu0 %v743_v37 }
  0x3f   :  { %716 = vmatpush3.bf16.msra.mxu0 %v741_v45 }
  0x82   :  { %v292_v47 = vpop.permute.xlu1 %291 }
  0x83   :  { %v282_v46 = vpop.permute.xlu0 %281 }
  0x86   :  { %v297_v49 = vpop.permute.xlu1 %296 }
  0x87   :  { %v287_v48 = vpop.permute.xlu0 %286 }
  0x8a   :  { %v307_v51 = vpop.permute.xlu1 %306 }
  0x8b   :  { %v302_v50 = vpop.permute.xlu0 %301 }
  0x8e   :  { %v317_v57 = vpop.permute.xlu1 %316 }
  0x8f   :  { %v312_v52 = vpop.permute.xlu0 %311 }
  0x92   :  { %v327_v6 = vpop.permute.xlu1 %326 }
  0x93   :  { %v322_v2 = vpop.permute.xlu0 %321 }
  0x96   :  { %v337_v23 = vpop.permute.xlu1 %336 }
  0x97   :  { %v332_v19 = vpop.permute.xlu0 %331 }
  0x9a   :  { %v347_v41 = vpop.permute.xlu1 %346 }
  0x9b   :  { %v342_v33 = vpop.permute.xlu0 %341 }
  0xf5   :  { %v667_v53 = vpop.f32.mrb[0].mxu0 }
  0xf6   :  { %v361_v55 = vmul.f32 %v667_v53, %v292_v47  ;;  %v200_v56 = vpop.f32.mrb[1].mxu0 }
  0xf7   :  { %v359_v58 = vmul.f32 %v282_v46, %v200_v56  ;;  %v668_v59 = vpop.f32.mrb[2].mxu0  ;;  %v357_v56 = vpop.permute.xlu1 %356 }
  0xf8   :  { %v384_v60 = vadd.f32 %v902_v54, %v361_v55  ;;  %v362_v61 = vmul.f32 %v668_v59, %v297_v49  ;;  %v203_v62 = vpop.f32.mrb[3].mxu0 }
  0xf9   :  { %v382_v63 = vadd.f32 %v902_v54, %v359_v58  ;;  %v360_v0 = vmul.f32 %v287_v48, %v203_v62  ;;  %v352_v48 = vpop.permute.xlu0 %351 }
  0xfa   :  { %v385_v1 = vadd.f32 %v902_v54, %v362_v61  ;;  %v400_v4 = vmax.f32 %v384_v60, 0.0 }
  0xfb   :  { %v383_v3 = vadd.f32 %v902_v54, %v360_v0  ;;  %v398_v7 = vmax.f32 %v382_v63, 0.0 }
  0xfc   :  { %v401_v5 = vmax.f32 %v385_v1, 0.0 }
  0xfd   :  { %v399_v8 = vmax.f32 %v383_v3, 0.0  ;;  %v671_v9 = vpop.f32.mrb[4].mxu0 }
  0xfe   :  { %v365_v10 = vmul.f32 %v671_v9, %v312_v52  ;;  %v216_v11 = vpop.f32.mrb[5].mxu0  ;;  %v417_v12 = vpack.c.bf16 %v401_v5, %v400_v4  ;;  %v415_v9 = vld [vmem:[%s938_s4] sm:$0xf] }
  0xff   :  { %v363_v13 = vmul.f32 %v302_v50, %v216_v11  ;;  %v672_v14 = vpop.f32.mrb[6].mxu0  ;;  %v416_v15 = vpack.c.bf16 %v399_v8, %v398_v7 }
 0x100   :  { %v388_v16 = vadd.f32 %v902_v54, %v365_v10  ;;  %v366_v17 = vmul.f32 %v672_v14, %v317_v57  ;;  %v219_v18 = vpop.f32.mrb[7].mxu0 }
 0x101   :  { %v386_v20 = vadd.f32 %v902_v54, %v363_v13  ;;  %v364_v21 = vmul.f32 %v307_v51, %v219_v18  ;;  %682 = vmatpush3.bf16.msra.mxu1 %v416_v15 }
 0x102   :  { %v389_v22 = vadd.f32 %v902_v54, %v366_v17  ;;  %683 = vmatprep.subr.bf16.mxu1 %v743_v37  ;;  %v404_v25 = vmax.f32 %v388_v16, 0.0 }
 0x103   :  { %v387_v24 = vadd.f32 %v902_v54, %v364_v21  ;;  %v402_v27 = vmax.f32 %v386_v20, 0.0 }
 0x104   :  { %v405_v26 = vmax.f32 %v389_v22, 0.0 }
 0x105   :  { %v403_v28 = vmax.f32 %v387_v24, 0.0  ;;  %v675_v29 = vpop.f32.mrb[8].mxu0  ;;  %684 = vmatpush3.bf16.msra.mxu1 %v417_v12 }
 0x106   :  { %v369_v30 = vmul.f32 %v675_v29, %v332_v19  ;;  %v232_v31 = vpop.f32.mrb[9].mxu0  ;;  %685 = vmatprep.subr.bf16.mxu1 %v743_v37  ;;  %v419_v32 = vpack.c.bf16 %v405_v26, %v404_v25 }
 0x107   :  { %v367_v34 = vmul.f32 %v322_v2, %v232_v31  ;;  %v676_v35 = vpop.f32.mrb[10].mxu0  ;;  %v418_v36 = vpack.c.bf16 %v403_v28, %v402_v27 }
 0x108   :  { %v392_v38 = vadd.f32 %v902_v54, %v369_v30  ;;  %v370_v39 = vmul.f32 %v676_v35, %v337_v23  ;;  %v235_v40 = vpop.f32.mrb[11].mxu0 }
 0x109   :  { %v390_v42 = vadd.f32 %v902_v54, %v367_v34  ;;  %v368_v43 = vmul.f32 %v327_v6, %v235_v40  ;;  %686 = vmatpush3.bf16.msra.mxu1 %v418_v36 }
 0x10a   :  { %v393_v44 = vadd.f32 %v902_v54, %v370_v39  ;;  %687 = vmatprep.subr.bf16.mxu1 %v743_v37  ;;  %v408_v46 = vmax.f32 %v392_v38, 0.0 }
 0x10b   :  { %v391_v45 = vadd.f32 %v902_v54, %v368_v43  ;;  %v406_v49 = vmax.f32 %v390_v42, 0.0 }
 0x10c   :  { %v409_v47 = vmax.f32 %v393_v44, 0.0 }
 0x10d   :  { %v407_v50 = vmax.f32 %v391_v45, 0.0  ;;  %v679_v51 = vpop.f32.mrb[12].mxu0  ;;  %688 = vmatpush3.bf16.msra.mxu1 %v419_v32 }
 0x10e   :  { %v373_v52 = vmul.f32 %v679_v51, %v352_v48  ;;  %v248_v53 = vpop.f32.mrb[13].mxu0  ;;  %689 = vmatprep.subr.bf16.mxu1 %v743_v37  ;;  %v421_v55 = vpack.c.bf16 %v409_v47, %v408_v46 }
 0x10f   :  { %v371_v57 = vmul.f32 %v342_v33, %v248_v53  ;;  %v680_v58 = vpop.f32.mrb[14].mxu0  ;;  %v420_v59 = vpack.c.bf16 %v407_v50, %v406_v49 }
 0x110   :  { %v396_v60 = vadd.f32 %v902_v54, %v373_v52  ;;  %v374_v61 = vmul.f32 %v680_v58, %v357_v56  ;;  %v251_v62 = vpop.f32.mrb[15].mxu0 }
 0x111   :  { %v394_v63 = vadd.f32 %v902_v54, %v371_v57  ;;  %v372_v0 = vmul.f32 %v347_v41, %v251_v62  ;;  %690 = vmatpush3.bf16.msra.mxu1 %v420_v59 }
 0x112   :  { %v397_v1 = vadd.f32 %v902_v54, %v374_v61  ;;  %691 = vmatprep.subr.bf16.mxu1 %v743_v37  ;;  %v412_v3 = vmax.f32 %v396_v60, 0.0 }
 0x113   :  { %v395_v2 = vadd.f32 %v902_v54, %v372_v0  ;;  %v410_v5 = vmax.f32 %v394_v63, 0.0 }
 0x114   :  { %v413_v4 = vmax.f32 %v397_v1, 0.0 }
 0x115   :  { %v411_v6 = vmax.f32 %v395_v2, 0.0  ;;  %692 = vmatpush3.bf16.msra.mxu1 %v421_v55 }
 0x116   :  { %693 = vmatprep.subr.bf16.mxu1 %v743_v37  ;;  %v423_v7 = vpack.c.bf16 %v413_v4, %v412_v3 }
 0x117   :  { %v422_v8 = vpack.c.bf16 %v411_v6, %v410_v5 }
 0x119   :  { %694 = vmatpush3.bf16.msra.mxu1 %v422_v8 }
 0x11a   :  { %695 = vmatprep.subr.bf16.mxu1 %v743_v37 }
 0x11d   :  { %696 = vmatpush3.bf16.msra.mxu1 %v423_v7 }
 0x120   :  { %698 = vmatmul.mubr.bf16.vlgmr.msra.gmra.mrb[0].mxu1 %v415_v9 }
 0x1f3   :  { %v458_v10 = vpop.f32.mrb[0].mxu1 }
 0x1f4   :  { %v470_v54 = vpack.c.bf16 %v458_v10, %v458_v10  ;;  %v699_v11 = vpop.f32.mrb[1].mxu1 }
 0x1f5   :  { %v461_v12 = vpop.f32.mrb[2].mxu1 }
 0x1f6   :  { %v700_v13 = vpop.f32.mrb[3].mxu1  ;;  %718 = vmatmul.mubr.bf16.vlgmr.msra.gmra.mrb[16].mxu0 %v470_v54 }
 0x2c9   :  { %v569_v14 = vpop.f32.mrb[16].mxu0 }
 0x2ca   :  { %575 = vst [vmem:[%s939_s6] sm:$0xff] %v569_v14  ;;  %v719_v15 = vpop.f32.mrb[17].mxu0 }
 0x2cb   :  { %v572_v16 = vpop.f32.mrb[18].mxu0 }
 0x2cc   :  { %v720_v37 = vpop.f32.mrb[19].mxu0 }

</bundles_post_ra>
